<compile_context>
chip_gen: v5e
topology: v5e:2x2
jax: 0.10.0
libtpu: 0.0.40
codegen_flags: <defaults>
</compile_context>

<pallas_src>
import functools

import jax
import jax.numpy as jnp
from jax import lax
from jax.experimental import pallas as pl
from jax.experimental.pallas import tpu as pltpu


def _round_up(x, m):
    return (x + m - 1) // m * m


def _conv_stats_kernel(xcol_ref, w_ref, y_ref, sum_ref, sq_ref, *, use_relu):
    """One M-tile: conv matmul (+optional ReLU), store tile, accumulate stats."""

    @pl.when(pl.program_id(0) == 0)
    def _init():
        sum_ref[...] = jnp.zeros_like(sum_ref)
        sq_ref[...] = jnp.zeros_like(sq_ref)

    acc = jnp.dot(xcol_ref[...], w_ref[...],
                  preferred_element_type=jnp.float32)   # bf16 x bf16 -> f32 MXU
    if use_relu:
        acc = jnp.maximum(acc, 0.0)

    y_ref[...] = acc
    # Per-tile partial reduction accumulated across tiles into the resident
    # (1, C_pad) accumulator outputs.  Zero-padded rows / channels contribute
    # exactly 0 to both sums, so the padding never perturbs the statistics.
    sum_ref[...] += jnp.sum(acc, axis=0, keepdims=True)
    sq_ref[...] += jnp.sum(acc * acc, axis=0, keepdims=True)


def _normalize_kernel(y_ref, scale_ref, bias_ref, out_ref):
    # Single fused multiply-add per element (scale/bias precomputed outside).
    out_ref[...] = y_ref[...] * scale_ref[...] + bias_ref[...]


def _choose_tm(m, kd, c_pad):
    """M-tile that stays well inside scoped VMEM on every TPU generation.

    Budget ~8 MiB for the double-buffered streaming tiles (bf16 xcol + f32 y):
    safe under the 16 MiB (v5e) / 32 MiB (v6e/v7x) scoped defaults and v7x's
    64 MiB physical VMEM.  128-aligned tiles match the v5e 128-wide MXU and
    its single vector-store slot.
    """
    budget = 8 * 1024 * 1024
    per_row = 2 * (kd * 2 + c_pad * 4)          # double-buffered per-row bytes
    tm = min(512, budget // per_row)
    tm = max(128, (tm // 128) * 128)
    if m <= tm:                                  # small problem: single tile
        tm = max(16, _round_up(m, 16))           # 16: bf16 sublane packing
    return int(tm)


def batch_norm_conv1d(x, weight, gamma, beta, *, stride=1, padding=0,
                      eps=1e-5, use_relu=True):
    """x: (N, C_in, L); weight: (C_out, C_in, K); gamma/beta: (C_out,)."""
    N, C_in, L = x.shape
    C_out, _, K = weight.shape

    L_pad = L + 2 * padding
    L_out = (L_pad - K) // stride + 1
    M = N * L_out
    Kd = C_in * K
    C_pad = _round_up(C_out, 128)                # lane-dense output channels

    # --- im2col (streamed in bf16: halves HBM traffic, 2x MXU rate) ---------
    # NOTE: this keeps the K-fold im2col expansion in HBM; an in-kernel sum
    # over K shifted (TM, C_in) taps would remove it entirely but needs
    # halo / manual-DMA handling, so it is deliberately not done here.
    xb = x.astype(jnp.bfloat16)
    if padding:
        xb = jnp.pad(xb, ((0, 0), (0, 0), (padding, padding)))
    taps = [xb[:, :, k: k + stride * L_out: stride] for k in range(K)]
    xk = jnp.stack(taps, axis=-1)                            # (N, C_in, L_out, K)
    xcol = jnp.transpose(xk, (0, 2, 1, 3)).reshape(M, Kd)    # (M, C_in*K)

    wmat = weight.reshape(C_out, Kd).T.astype(jnp.float32)   # (Kd, C_out)
    wmat = jnp.pad(wmat, ((0, 0), (0, C_pad - C_out))).astype(jnp.bfloat16)
    gamma_p = jnp.pad(gamma.astype(jnp.float32), (0, C_pad - C_out))
    beta_p = jnp.pad(beta.astype(jnp.float32), (0, C_pad - C_out))

    TM = _choose_tm(M, Kd, C_pad)
    M_pad = _round_up(M, TM)
    if M_pad > M:
        xcol = jnp.pad(xcol, ((0, M_pad - M), (0, 0)))       # zero rows: no-op for stats
    grid_m = M_pad // TM

    # --- pass A: conv + channel statistics (accumulator across tiles) -------
    flops_a = 2 * M_pad * Kd * C_pad
    bytes_a = M_pad * Kd * 2 + Kd * C_pad * 2 + M_pad * C_pad * 4 + 2 * C_pad * 4
    y, sums, sqs = pl.pallas_call(
        functools.partial(_conv_stats_kernel, use_relu=use_relu),
        grid=(grid_m,),
        in_specs=[
            pl.BlockSpec((TM, Kd), lambda i: (i, 0)),
            pl.BlockSpec((Kd, C_pad), lambda i: (0, 0)),
        ],
        out_specs=(
            pl.BlockSpec((TM, C_pad), lambda i: (i, 0)),
            pl.BlockSpec((1, C_pad), lambda i: (0, 0)),      # resident accumulator
            pl.BlockSpec((1, C_pad), lambda i: (0, 0)),      # resident accumulator
        ),
        out_shape=(
            jax.ShapeDtypeStruct((M_pad, C_pad), jnp.float32),
            jax.ShapeDtypeStruct((1, C_pad), jnp.float32),
            jax.ShapeDtypeStruct((1, C_pad), jnp.float32),
        ),
        compiler_params=pltpu.CompilerParams(
            dimension_semantics=("arbitrary",),              # cross-tile accumulators
            vmem_limit_bytes=32 * 1024 * 1024),
        cost_estimate=pl.CostEstimate(
            flops=int(flops_a), transcendentals=0, bytes_accessed=int(bytes_a)),
    )(xcol, wmat)

    # --- tiny (C,) interlude: fold BN into one scale/bias per channel -------
    m_true = jnp.float32(M)
    mean = sums[0] / m_true
    # Biased variance (PyTorch BN normalizes with biased var in training mode).
    # f32 sum/sumsq; clamp guards against tiny negative cancellation.
    var = jnp.maximum(sqs[0] / m_true - mean * mean, 0.0)
    inv_std = lax.rsqrt(var + eps)
    scale = (gamma_p * inv_std)[None, :]                     # (1, C_pad)
    bias = (beta_p - mean * gamma_p * inv_std)[None, :]      # (1, C_pad)

    # --- pass B: normalize (independent tiles -> parallel, in-place alias) --
    flops_b = 2 * M_pad * C_pad
    bytes_b = 2 * M_pad * C_pad * 4 + 2 * C_pad * 4
    out = pl.pallas_call(
        _normalize_kernel,
        grid=(grid_m,),
        in_specs=[
            pl.BlockSpec((TM, C_pad), lambda i: (i, 0)),
            pl.BlockSpec((1, C_pad), lambda i: (0, 0)),
            pl.BlockSpec((1, C_pad), lambda i: (0, 0)),
        ],
        out_specs=pl.BlockSpec((TM, C_pad), lambda i: (i, 0)),
        out_shape=jax.ShapeDtypeStruct((M_pad, C_pad), jnp.float32),
        input_output_aliases={0: 0},                         # reuse conv buffer
        compiler_params=pltpu.CompilerParams(
            dimension_semantics=("parallel",),               # both TCs on v7x
            vmem_limit_bytes=32 * 1024 * 1024),
        cost_estimate=pl.CostEstimate(
            flops=int(flops_b), transcendentals=0, bytes_accessed=int(bytes_b)),
    )(y, scale, bias)

    # TODO(synk): BatchNorm1d (training mode) also updates running_mean /
    # running_var buffers (with unbiased variance); those side-effect buffers
    # are not part of the module's returned tensor and are not produced here.
    out = out[:M, :C_out].reshape(N, L_out, C_out)
    return jnp.transpose(out, (0, 2, 1))                     # (N, C_out, L_out)


def _reference(x, weight, gamma, beta, *, stride=1, padding=0, eps=1e-5,
               use_relu=True):
    # Matches the kernel's bf16 input quantization so the comparison isolates
    # kernel correctness from the intended low-precision streaming.
    xq = x.astype(jnp.bfloat16).astype(jnp.float32)
    wq = weight.astype(jnp.bfloat16).astype(jnp.float32)
    y = lax.conv_general_dilated(
        xq, wq, window_strides=(stride,), padding=[(padding, padding)],
        dimension_numbers=("NCH", "OIH", "NCH"))
    if use_relu:
        y = jnp.maximum(y, 0.0)
    mean = jnp.mean(y, axis=(0, 2), keepdims=True)
    var = jnp.mean((y - mean) ** 2, axis=(0, 2), keepdims=True)
    return (y - mean) / jnp.sqrt(var + eps) * gamma[None, :, None] \
        + beta[None, :, None]


if __name__ == "__main__":
    key = jax.random.PRNGKey(0)
    k1, k2, k3, k4 = jax.random.split(key, 4)

    N, C_in, C_out, L, K = 2, 4, 8, 16, 3
    x = jax.random.normal(k1, (N, C_in, L), dtype=jnp.float32)
    weight = jax.random.normal(k2, (C_out, C_in, K), dtype=jnp.float32) * 0.1
    gamma = 1.0 + 0.1 * jax.random.normal(k3, (C_out,), dtype=jnp.float32)
    beta = 0.1 * jax.random.normal(k4, (C_out,), dtype=jnp.float32)

    # Config 1: stride=1, padding=1, ReLU activation.
    fwd1 = jax.jit(functools.partial(batch_norm_conv1d, stride=1, padding=1,
                                     use_relu=True))
    out1 = jax.block_until_ready(fwd1(x, weight, gamma, beta))
    ref1 = _reference(x, weight, gamma, beta, stride=1, padding=1, use_relu=True)
    assert out1.shape == ref1.shape
    assert float(jnp.max(jnp.abs(out1 - ref1))) < 2e-3, "mismatch (cfg 1)"

    # Config 2: stride=2, padding=0, no activation.
    fwd2 = jax.jit(functools.partial(batch_norm_conv1d, stride=2, padding=0,
                                     use_relu=False))
    out2 = jax.block_until_ready(fwd2(x, weight, gamma, beta))
    ref2 = _reference(x, weight, gamma, beta, stride=2, padding=0, use_relu=False)
    assert out2.shape == ref2.shape
    assert float(jnp.max(jnp.abs(out2 - ref2))) < 2e-3, "mismatch (cfg 2)"

    print("KERNEL_OK")
</pallas_src>

<mosaic_0001>
module attributes {stable_mosaic.version = 11 : i64} {
  func.func @_normalize_kernel(%arg0: i32, %arg1: memref<32x128xf32, #tpu.memory_space<vmem>>, %arg2: memref<1x128xf32, #tpu.memory_space<vmem>>, %arg3: memref<1x128xf32, #tpu.memory_space<vmem>>, %arg4: memref<32x128xf32, #tpu.memory_space<vmem>>) attributes {dimension_semantics = [#tpu.dimension_semantics<parallel>], iteration_bounds = array<i64: 1>, scalar_prefetch = 0 : i64, scratch_operands = 0 : i64, tpu.core_type = #tpu.core_type<tc>, window_params = [{transform_indices = @transform_0, window_bounds = array<i64: 32, 128>}, {pipeline_mode = #tpu.pipeline_mode<synchronous>, transform_indices = @transform_1, window_bounds = array<i64: 1, 128>}, {pipeline_mode = #tpu.pipeline_mode<synchronous>, transform_indices = @transform_2, window_bounds = array<i64: 1, 128>}, {transform_indices = @transform_3, window_bounds = array<i64: 32, 128>}]} {
    %c0 = arith.constant 0 : index
    %c0_0 = arith.constant 0 : index
    %0 = vector.load %arg1[%c0, %c0_0] : memref<32x128xf32, #tpu.memory_space<vmem>>, vector<32x128xf32>
    %c0_1 = arith.constant 0 : index
    %c0_2 = arith.constant 0 : index
    %1 = vector.load %arg2[%c0_1, %c0_2] : memref<1x128xf32, #tpu.memory_space<vmem>>, vector<1x128xf32>
    %2 = vector.broadcast %1 : vector<1x128xf32> to vector<32x128xf32>
    %3 = arith.mulf %0, %2 : vector<32x128xf32>
    %c0_3 = arith.constant 0 : index
    %c0_4 = arith.constant 0 : index
    %4 = vector.load %arg3[%c0_3, %c0_4] : memref<1x128xf32, #tpu.memory_space<vmem>>, vector<1x128xf32>
    %5 = vector.broadcast %4 : vector<1x128xf32> to vector<32x128xf32>
    %6 = arith.addf %3, %5 : vector<32x128xf32>
    %c0_5 = arith.constant 0 : index
    %c0_6 = arith.constant 0 : index
    %7 = vector.load %arg4[%c0_5, %c0_6] : memref<32x128xf32, #tpu.memory_space<vmem>>, vector<32x128xf32>
    tpu.vector_store %arg4[%c0_5, %c0_6], %6 {strides = array<i32>} : memref<32x128xf32, #tpu.memory_space<vmem>>, vector<32x128xf32>,
    return
  }
  func.func @transform_0(%arg0: i32) -> (i32, i32) {
    %c0_i32 = arith.constant 0 : i32
    %c0_i32_0 = arith.constant 0 : i32
    return %arg0, %c0_i32 : i32, i32
  }
  func.func @transform_1(%arg0: i32) -> (i32, i32) {
    %c0_i32 = arith.constant 0 : i32
    %c0_i32_0 = arith.constant 0 : i32
    %c0_i32_1 = arith.constant 0 : i32
    return %c0_i32, %c0_i32_0 : i32, i32
  }
  func.func @transform_2(%arg0: i32) -> (i32, i32) {
    %c0_i32 = arith.constant 0 : i32
    %c0_i32_0 = arith.constant 0 : i32
    %c0_i32_1 = arith.constant 0 : i32
    return %c0_i32, %c0_i32_0 : i32, i32
  }
  func.func @transform_3(%arg0: i32) -> (i32, i32) {
    %c0_i32 = arith.constant 0 : i32
    %c0_i32_0 = arith.constant 0 : i32
    return %arg0, %c0_i32 : i32, i32
  }
}

module attributes {stable_mosaic.version = 11 : i64} {
  func.func @_conv_stats_kernel(%arg0: i32, %arg1: memref<32x12xbf16, #tpu.memory_space<vmem>>, %arg2: memref<12x128xbf16, #tpu.memory_space<vmem>>, %arg3: memref<32x128xf32, #tpu.memory_space<vmem>>, %arg4: memref<1x128xf32, #tpu.memory_space<vmem>>, %arg5: memref<1x128xf32, #tpu.memory_space<vmem>>) attributes {dimension_semantics = [#tpu.dimension_semantics<arbitrary>], iteration_bounds = array<i64: 1>, scalar_prefetch = 0 : i64, scratch_operands = 0 : i64, tpu.core_type = #tpu.core_type<tc>, window_params = [{transform_indices = @transform_0, window_bounds = array<i64: 32, 12>}, {pipeline_mode = #tpu.pipeline_mode<synchronous>, transform_indices = @transform_1, window_bounds = array<i64: 12, 128>}, {transform_indices = @transform_2, window_bounds = array<i64: 32, 128>}, {pipeline_mode = #tpu.pipeline_mode<synchronous>, transform_indices = @transform_3, window_bounds = array<i64: 1, 128>}, {pipeline_mode = #tpu.pipeline_mode<synchronous>, transform_indices = @transform_4, window_bounds = array<i64: 1, 128>}]} {
    %c0_i32 = arith.constant 0 : i32
    %0 = arith.cmpi eq, %arg0, %c0_i32 : i32
    %1 = arith.extui %0 : i1 to i32
    %c0_i32_0 = arith.constant 0 : i32
    %2 = arith.cmpi ne, %1, %c0_i32_0 : i32
    scf.if %2 {
      %cst_17 = arith.constant 0.000000e+00 : f32
      %20 = vector.broadcast %cst_17 : f32 to vector<1x128xf32>
      %c0_18 = arith.constant 0 : index
      %c0_19 = arith.constant 0 : index
      %21 = vector.load %arg4[%c0_18, %c0_19] : memref<1x128xf32, #tpu.memory_space<vmem>>, vector<1x128xf32>
      tpu.vector_store %arg4[%c0_18, %c0_19], %20 {strides = array<i32>} : memref<1x128xf32, #tpu.memory_space<vmem>>, vector<1x128xf32>,
      %cst_20 = arith.constant 0.000000e+00 : f32
      %22 = vector.broadcast %cst_20 : f32 to vector<1x128xf32>
      %c0_21 = arith.constant 0 : index
      %c0_22 = arith.constant 0 : index
      %23 = vector.load %arg5[%c0_21, %c0_22] : memref<1x128xf32, #tpu.memory_space<vmem>>, vector<1x128xf32>
      tpu.vector_store %arg5[%c0_21, %c0_22], %22 {strides = array<i32>} : memref<1x128xf32, #tpu.memory_space<vmem>>, vector<1x128xf32>,
    } else {
    }
    %c0 = arith.constant 0 : index
    %c0_1 = arith.constant 0 : index
    %3 = vector.load %arg1[%c0, %c0_1] : memref<32x12xbf16, #tpu.memory_space<vmem>>, vector<32x12xbf16>
    %c0_2 = arith.constant 0 : index
    %c0_3 = arith.constant 0 : index
    %4 = vector.load %arg2[%c0_2, %c0_3] : memref<12x128xbf16, #tpu.memory_space<vmem>>, vector<12x128xbf16>
    %cst = arith.constant dense<0.000000e+00> : vector<32x128xf32>
    %5 = tpu.matmul %3, %4, %cst {dimension_numbers = #tpu.dot_dimension_numbers<[1], [0], [0], [1], [0, 0, 1, 1], [], []>} : vector<32x12xbf16>, vector<12x128xbf16>, vector<32x128xf32> -> vector<32x128xf32>
    %cst_4 = arith.constant 0.000000e+00 : f32
    %6 = vector.broadcast %cst_4 : f32 to vector<32x128xf32>
    %7 = arith.maximumf %5, %6 : vector<32x128xf32>
    %c0_5 = arith.constant 0 : index
    %c0_6 = arith.constant 0 : index
    %8 = vector.load %arg3[%c0_5, %c0_6] : memref<32x128xf32, #tpu.memory_space<vmem>>, vector<32x128xf32>
    tpu.vector_store %arg3[%c0_5, %c0_6], %7 {strides = array<i32>} : memref<32x128xf32, #tpu.memory_space<vmem>>, vector<32x128xf32>,
    %c0_7 = arith.constant 0 : index
    %c0_8 = arith.constant 0 : index
    %9 = vector.load %arg4[%c0_7, %c0_8] : memref<1x128xf32, #tpu.memory_space<vmem>>, vector<1x128xf32>
    %cst_9 = arith.constant dense<0.000000e+00> : vector<128xf32>
    %10 = vector.multi_reduction <add>, %7, %cst_9 [0] : vector<32x128xf32> to vector<128xf32>
    %11 = vector.shape_cast %10 : vector<128xf32> to vector<1x128xf32>
    %12 = arith.addf %9, %11 : vector<1x128xf32>
    %c0_10 = arith.constant 0 : index
    %c0_11 = arith.constant 0 : index
    %13 = vector.load %arg4[%c0_10, %c0_11] : memref<1x128xf32, #tpu.memory_space<vmem>>, vector<1x128xf32>
    tpu.vector_store %arg4[%c0_10, %c0_11], %12 {strides = array<i32>} : memref<1x128xf32, #tpu.memory_space<vmem>>, vector<1x128xf32>,
    %c0_12 = arith.constant 0 : index
    %c0_13 = arith.constant 0 : index
    %14 = vector.load %arg5[%c0_12, %c0_13] : memref<1x128xf32, #tpu.memory_space<vmem>>, vector<1x128xf32>
    %15 = arith.mulf %7, %7 : vector<32x128xf32>
    %cst_14 = arith.constant dense<0.000000e+00> : vector<128xf32>
    %16 = vector.multi_reduction <add>, %15, %cst_14 [0] : vector<32x128xf32> to vector<128xf32>
    %17 = vector.shape_cast %16 : vector<128xf32> to vector<1x128xf32>
    %18 = arith.addf %14, %17 : vector<1x128xf32>
    %c0_15 = arith.constant 0 : index
    %c0_16 = arith.constant 0 : index
    %19 = vector.load %arg5[%c0_15, %c0_16] : memref<1x128xf32, #tpu.memory_space<vmem>>, vector<1x128xf32>
    tpu.vector_store %arg5[%c0_15, %c0_16], %18 {strides = array<i32>} : memref<1x128xf32, #tpu.memory_space<vmem>>, vector<1x128xf32>,
    return
  }
  func.func @transform_0(%arg0: i32) -> (i32, i32) {
    %c0_i32 = arith.constant 0 : i32
    %c0_i32_0 = arith.constant 0 : i32
    return %arg0, %c0_i32 : i32, i32
  }
  func.func @transform_1(%arg0: i32) -> (i32, i32) {
    %c0_i32 = arith.constant 0 : i32
    %c0_i32_0 = arith.constant 0 : i32
    %c0_i32_1 = arith.constant 0 : i32
    return %c0_i32, %c0_i32_0 : i32, i32
  }
  func.func @transform_2(%arg0: i32) -> (i32, i32) {
    %c0_i32 = arith.constant 0 : i32
    %c0_i32_0 = arith.constant 0 : i32
    return %arg0, %c0_i32 : i32, i32
  }
  func.func @transform_3(%arg0: i32) -> (i32, i32) {
    %c0_i32 = arith.constant 0 : i32
    %c0_i32_0 = arith.constant 0 : i32
    %c0_i32_1 = arith.constant 0 : i32
    return %c0_i32, %c0_i32_0 : i32, i32
  }
  func.func @transform_4(%arg0: i32) -> (i32, i32) {
    %c0_i32 = arith.constant 0 : i32
    %c0_i32_0 = arith.constant 0 : i32
    %c0_i32_1 = arith.constant 0 : i32
    return %c0_i32, %c0_i32_0 : i32, i32
  }
}

</mosaic_0001>

<bundles_post_ra>
// kernel: batch_norm_conv1d.3
= control target key start
LH: loop header
LB: loop body
LE: loop exit
PB: predicated region body
PF: predicated region fallthrough
CT: control target
= control target key end

     0   :  { %s94_s0 = inlined_call_operand.vmem [shape: f32[32,128], index: 0, kind: input, shape index: {}, may-alias: {0,3}]   ;;  %s95_s1 = inlined_call_operand.vmem [shape: f32[1,128], index: 1, kind: input, shape index: {}]   ;;  %s96_s2 = inlined_call_operand.vmem [shape: f32[1,128], index: 2, kind: input, shape index: {}]   ;;  %s97_s3 = inlined_call_operand.vmem [shape: f32[32,128], index: 3, kind: output, shape index: {}, may-alias: {0,3}]  }
   0x1   :  { %v14_v0 = vld [vmem:[%s94_s0] sm:$0xff]  ;;  %v15_v3 = vld [vmem:[%s94_s0 + $0x8] sm:$0xff]  ;;  %v16_v6 = vld [vmem:[%s94_s0 + $0x10] sm:$0xff] }
   0x2   :  { %v42_v1 = vld [vmem:[%s95_s1] ss:$0 sm:$0xff]  ;;  %v17_v7 = vld [vmem:[%s94_s0 + $0x18] sm:$0xff] }
   0x3   :  { %v43_v2 = vld [vmem:[%s96_s2] ss:$0 sm:$0xff]  ;;  %v22_v4 = vmul.f32 %v42_v1, %v14_v0  ;;  %v23_v5 = vmul.f32 %v42_v1, %v15_v3  ;;  %v24_v8 = vmul.f32 %v42_v1, %v16_v6  ;;  %v25_v9 = vmul.f32 %v42_v1, %v17_v7 }
   0x5   :  { %v30_v10 = vadd.f32 %v43_v2, %v22_v4  ;;  %v31_v11 = vadd.f32 %v43_v2, %v23_v5  ;;  %v32_v12 = vadd.f32 %v43_v2, %v24_v8  ;;  %v33_v13 = vadd.f32 %v43_v2, %v25_v9 }
   0x7   :  { %34 = vst [vmem:[%s97_s3] sm:$0xff] %v30_v10 }
   0x8   :  { %35 = vst [vmem:[%s97_s3 + $0x8] sm:$0xff] %v31_v11 }
   0x9   :  { %36 = vst [vmem:[%s97_s3 + $0x10] sm:$0xff] %v32_v12 }
   0xa   :  { %37 = vst [vmem:[%s97_s3 + $0x18] sm:$0xff] %v33_v13 }

// kernel: batch_norm_conv1d.2
= control target key start
LH: loop header
LB: loop body
LE: loop exit
PB: predicated region body
PF: predicated region fallthrough
CT: control target
= control target key end

     0   :  { %vm49_vm0 = vcmask 1045504   ;;  %vm42_vm1 = vcmask 97280   ;;  %v139_v6 = vmov 0.0   ;;  %s207_s1 = inlined_call_operand.vmem [shape: bf16[12,128], index: 1, kind: input, shape index: {}]   ;;  %s208_s0 = inlined_call_operand.vmem [shape: bf16[32,12], index: 0, kind: input, shape index: {}]   ;;  %s209_s3 = inlined_call_operand.vmem [shape: f32[1,128], index: 3, kind: output, shape index: {1}]   ;;  %s210_s4 = inlined_call_operand.vmem [shape: f32[1,128], index: 4, kind: output, shape index: {2}]   ;;  %s211_s2 = inlined_call_operand.vmem [shape: f32[32,128], index: 2, kind: output, shape index: {0}]  }
   0x1   :  { %v130_v0 = vld [vmem:[%s207_s1] sm:$0xf]  ;;  %v136_v1 = vld [vmem:[%s207_s1] sm:$0x30]  ;;  %v135_v5 = vld [vmem:[%s208_s0 + $0x8] sm:$0xff]  ;;  %19 = vst [vmem:[%s209_s3] sm:$0x1] %v139_v6 }
   0x2   :  { %v131_v2 = vor.u32 %v136_v1, %v130_v0  ;;  %v134_v4 = vld [vmem:[%s208_s0] sm:$0xff]  ;;  %20 = vst [vmem:[%s210_s4] sm:$0x1] %v139_v6 }
   0x4   :  { %v51_v3 = vsel %vm49_vm0, %v131_v2, 0 }
   0x5   :  { %60 = vmatpush.bf16.msra.mxu0 %v51_v3  ;;  %137 = vmatpush.bf16.msra.mxu1 %v51_v3 }
   0x8   :  { %132 = vmatmul.msk.bf16.vlgmr.msra.gmra.mxu0 %vm42_vm1, %v134_v4  ;;  %133 = vmatmul.msk.bf16.vlgmr.msra.gmra.mxu1 %vm42_vm1, %v135_v5  ;;  %v80_v34 = vld [vmem:[%s209_s3] sm:$0x1] }
   0x9   :  { %v92_v37 = vld [vmem:[%s210_s4] sm:$0x1] }
  0x85   :  { %v62_v7 = vpop.f32.mrf.mxu0  ;;  %v67_v8 = vpop.f32.mrf.mxu1 }
  0x86   :  { %v72_v9 = vmax.f32 %v62_v7, 0.0  ;;  %v74_v10 = vmax.f32 %v67_v8, 0.0 }
  0x88   :  { %76 = vst [vmem:[%s211_s2] sm:$0xff] %v72_v9  ;;  %v93_v15 = vmul.f32 %v72_v9, %v72_v9  ;;  %v95_v18 = vmul.f32 %v74_v10, %v74_v10 }
  0x89   :  { %78 = vst [vmem:[%s211_s2 + $0x10] sm:$0xff] %v74_v10 }
  0x8d   :  { %v64_v11 = vpop.f32.mrf.mxu0  ;;  %v69_v12 = vpop.f32.mrf.mxu1 }
  0x8e   :  { %v73_v13 = vmax.f32 %v64_v11, 0.0  ;;  %v75_v14 = vmax.f32 %v69_v12, 0.0 }
  0x90   :  { %77 = vst [vmem:[%s211_s2 + $0x8] sm:$0xff] %v73_v13  ;;  %v81_v16 = vadd.f32 %v73_v13, %v72_v9  ;;  %v94_v17 = vmul.f32 %v73_v13, %v73_v13  ;;  %v96_v22 = vmul.f32 %v75_v14, %v75_v14 }
  0x91   :  { %79 = vst [vmem:[%s211_s2 + $0x18] sm:$0xff] %v75_v14 }
  0x92   :  { %v97_v19 = vadd.f32 %v94_v17, %v93_v15  ;;  %v82_v20 = vadd.f32 %v81_v16, %v74_v10 }
  0x94   :  { %v83_v21 = vadd.f32 %v82_v20, %v75_v14  ;;  %v98_v23 = vadd.f32 %v97_v19, %v95_v18 }
  0x96   :  { %v84_v24 = vrot.slane %v83_v21, 4  ;;  %v99_v25 = vadd.f32 %v98_v23, %v96_v22 }
  0x98   :  { %v85_v26 = vadd.f32 %v84_v24, %v83_v21  ;;  %v100_v27 = vrot.slane %v99_v25, 4 }
  0x9a   :  { %v86_v28 = vrot.slane %v85_v26, 2  ;;  %v101_v29 = vadd.f32 %v100_v27, %v99_v25 }
  0x9c   :  { %v87_v30 = vadd.f32 %v86_v28, %v85_v26  ;;  %v102_v31 = vrot.slane %v101_v29, 2 }
  0x9e   :  { %v88_v32 = vrot.slane %v87_v30, 1  ;;  %v103_v33 = vadd.f32 %v102_v31, %v101_v29 }
  0xa0   :  { %v89_v35 = vadd.f32 %v88_v32, %v87_v30  ;;  %v104_v36 = vrot.slane %v103_v33, 1 }
  0xa2   :  { %v90_v38 = vadd.f32 %v89_v35, %v80_v34  ;;  %v105_v39 = vadd.f32 %v104_v36, %v103_v33 }
  0xa4   :  { %91 = vst [vmem:[%s209_s3] sm:$0x1] %v90_v38  ;;  %v106_v40 = vadd.f32 %v105_v39, %v92_v37 }
  0xa6   :  { %107 = vst [vmem:[%s210_s4] sm:$0x1] %v106_v40 }

</bundles_post_ra>
